<compile_context>
chip_gen: v7x
topology: tpu7x:2x2x1
jax: 0.10.0
libtpu: 0.0.40
codegen_flags: <defaults>
</compile_context>

<pallas_src>
import math

import jax
import jax.numpy as jnp
from jax.experimental import pallas as pl
from jax.experimental.pallas import tpu as pltpu


def _exp_normal_smearing_kernel(cutoff_lower, cutoff_upper, alpha, out_dtype):
    """Returns a kernel closure over the static module constants."""

    def kernel(dist_ref, means_ref, betas_ref, out_ref):
        d = dist_ref[...]          # (1, TN)  float32, lane-dense
        means = means_ref[...]     # (R, 1)   float32
        betas = betas_ref[...]     # (R, 1)   float32

        # CosineCutoff with cutoff_lower == 0 (module hardcodes CosineCutoff(0, upper)).
        cutoffs = 0.5 * (jnp.cos(d * (math.pi / cutoff_upper)) + 1.0)
        cutoffs = cutoffs * (d < cutoff_upper).astype(d.dtype)          # (1, TN)

        # exp(alpha * (-d + lo)) is computed once per distance (1, TN), then the
        # subtraction against (R, 1) means is a cheap sublane replication.
        ed = jnp.exp(alpha * (-d + cutoff_lower))                        # (1, TN)
        e = ed - means                                                   # (R, TN)
        out_ref[...] = (cutoffs * jnp.exp(-betas * e * e)).astype(out_dtype)

    return kernel


def exp_normal_smearing(dist, means, betas, *, cutoff_lower=0.0, cutoff_upper=5.0,
                        tile_n=2048, out_dtype=jnp.float32):
    """dist: (N,) float32; means/betas: (num_rbf,) float32 -> (N, num_rbf).

    tile_n: distances processed per grid step (multiple of 128).  Large tiles
    amortize the ~0.35us per-grid-step pipeline overhead; at num_rbf=50, f32,
    even tile_n=8192 is only ~1.6 MB per output block (double-buffered ~3.2 MB),
    well inside scoped VMEM on v5e/v6e/v7x.
    out_dtype: set to jnp.bfloat16 on v6e/v7x to halve writeback bytes and use
    the bf16 EUP path; keep float32 on v5e.
    """
    n = dist.shape[0]
    num_rbf = means.shape[0]
    alpha = 5.0 / (cutoff_upper - cutoff_lower)

    if tile_n % 128 != 0:
        raise ValueError("tile_n must be a multiple of 128 (TPU lane width)")

    num_tiles = pl.cdiv(n, tile_n)
    padded_n = num_tiles * tile_n

    # Lane-dense layout: distances along the lane axis; pad the tail (sliced off
    # below, and the padded distances hit the cutoff mask anyway).
    dist_row = dist.astype(jnp.float32).reshape(1, n)
    if padded_n != n:
        dist_row = jnp.pad(dist_row, ((0, 0), (0, padded_n - n)),
                           constant_values=cutoff_upper)
    means_col = means.astype(jnp.float32).reshape(num_rbf, 1)
    betas_col = betas.astype(jnp.float32).reshape(num_rbf, 1)

    kernel = _exp_normal_smearing_kernel(cutoff_lower, cutoff_upper, alpha, out_dtype)

    out_rn = pl.pallas_call(
        kernel,
        out_shape=jax.ShapeDtypeStruct((num_rbf, padded_n), out_dtype),
        grid_spec=pltpu.PrefetchScalarGridSpec(
            num_scalar_prefetch=0,
            grid=(num_tiles,),
            in_specs=[
                pl.BlockSpec((1, tile_n), lambda i: (0, i)),        # dist, lane-dense
                pl.BlockSpec((num_rbf, 1), lambda i: (0, 0)),       # means (constant block)
                pl.BlockSpec((num_rbf, 1), lambda i: (0, 0)),       # betas (constant block)
            ],
            out_specs=pl.BlockSpec((num_rbf, tile_n), lambda i: (0, i)),
        ),
        compiler_params=pltpu.CompilerParams(
            dimension_semantics=("parallel",),      # v7x: shards grid steps across TCs
            vmem_limit_bytes=32 * 1024 * 1024,
        ),
    )(dist_row, means_col, betas_col)

    # One transpose outside the kernel to match PyTorch's (N, num_rbf) output.
    return out_rn[:, :n].T


def initial_params(cutoff_lower=0.0, cutoff_upper=5.0, num_rbf=50):
    """Deterministic parameter init, matching ExpNormalSmearing._initial_params."""
    start_value = math.exp(-cutoff_upper + cutoff_lower)
    means = jnp.linspace(start_value, 1.0, num_rbf, dtype=jnp.float32)
    betas = jnp.full((num_rbf,), (2.0 / num_rbf * (1.0 - start_value)) ** (-2),
                     dtype=jnp.float32)
    return means, betas


def reference_jax(dist, means, betas, cutoff_lower=0.0, cutoff_upper=5.0):
    """Pure-JAX reference mirroring the PyTorch forward."""
    alpha = 5.0 / (cutoff_upper - cutoff_lower)
    d = dist[:, None]
    cutoffs = 0.5 * (jnp.cos(d * math.pi / cutoff_upper) + 1.0)
    cutoffs = cutoffs * (d < cutoff_upper).astype(d.dtype)
    return cutoffs * jnp.exp(-betas[None, :] *
                             (jnp.exp(alpha * (-d + cutoff_lower)) - means[None, :]) ** 2)


if __name__ == "__main__":
    cutoff_lower, cutoff_upper, num_rbf = 0.0, 5.0, 50
    n_edges = 300  # deliberately NOT a multiple of the tile -> exercises padded tail

    key = jax.random.PRNGKey(0)
    # distances in [0, 6): some exceed cutoff_upper to exercise the cutoff mask
    dist = jax.random.uniform(key, (n_edges,), dtype=jnp.float32, minval=0.0, maxval=6.0)

    means, betas = initial_params(cutoff_lower, cutoff_upper, num_rbf)

    # Small tile for the small test so the grid still has >1 step; the default
    # tile_n=2048 is what production-sized edge counts should use.
    out = exp_normal_smearing(dist, means, betas,
                              cutoff_lower=cutoff_lower, cutoff_upper=cutoff_upper,
                              tile_n=256)
    out = jax.block_until_ready(out)

    ref = reference_jax(dist, means, betas, cutoff_lower, cutoff_upper)
    assert out.shape == (n_edges, num_rbf)
    assert jnp.allclose(out, ref, atol=1e-5, rtol=1e-5), "mismatch vs. reference"

    print("KERNEL_OK")
</pallas_src>

<mosaic_0001>
module attributes {stable_mosaic.version = 11 : i64} {
  func.func @kernel(%arg0: i32, %arg1: memref<1x256xf32, #tpu.memory_space<vmem>>, %arg2: memref<50x1xf32, #tpu.memory_space<vmem>>, %arg3: memref<50x1xf32, #tpu.memory_space<vmem>>, %arg4: memref<50x256xf32, #tpu.memory_space<vmem>>) attributes {dimension_semantics = [#tpu.dimension_semantics<parallel>], iteration_bounds = array<i64: 2>, scalar_prefetch = 0 : i64, scratch_operands = 0 : i64, tpu.core_type = #tpu.core_type<tc>, window_params = [{transform_indices = @transform_0, window_bounds = array<i64: 1, 256>}, {pipeline_mode = #tpu.pipeline_mode<synchronous>, transform_indices = @transform_1, window_bounds = array<i64: 50, 1>}, {pipeline_mode = #tpu.pipeline_mode<synchronous>, transform_indices = @transform_2, window_bounds = array<i64: 50, 1>}, {transform_indices = @transform_3, window_bounds = array<i64: 50, 256>}]} {
    %c0 = arith.constant 0 : index
    %c0_0 = arith.constant 0 : index
    %0 = vector.load %arg1[%c0, %c0_0] : memref<1x256xf32, #tpu.memory_space<vmem>>, vector<1x256xf32>
    %c0_1 = arith.constant 0 : index
    %c0_2 = arith.constant 0 : index
    %1 = vector.load %arg2[%c0_1, %c0_2] : memref<50x1xf32, #tpu.memory_space<vmem>>, vector<50x1xf32>
    %c0_3 = arith.constant 0 : index
    %c0_4 = arith.constant 0 : index
    %2 = vector.load %arg3[%c0_3, %c0_4] : memref<50x1xf32, #tpu.memory_space<vmem>>, vector<50x1xf32>
    %cst = arith.constant 0.628318548 : f32
    %3 = vector.broadcast %cst : f32 to vector<1x256xf32>
    %4 = arith.mulf %0, %3 : vector<1x256xf32>
    %5 = math.cos %4 : vector<1x256xf32>
    %cst_5 = arith.constant 1.000000e+00 : f32
    %6 = vector.broadcast %cst_5 : f32 to vector<1x256xf32>
    %7 = arith.addf %5, %6 : vector<1x256xf32>
    %cst_6 = arith.constant 5.000000e-01 : f32
    %8 = vector.broadcast %cst_6 : f32 to vector<1x256xf32>
    %9 = arith.mulf %8, %7 : vector<1x256xf32>
    %cst_7 = arith.constant 5.000000e+00 : f32
    %10 = vector.broadcast %cst_7 : f32 to vector<1x256xf32>
    %11 = arith.cmpf olt, %0, %10 : vector<1x256xf32>
    %12 = arith.extui %11 : vector<1x256xi1> to vector<1x256xi32>
    %13 = arith.sitofp %12 : vector<1x256xi32> to vector<1x256xf32>
    %14 = arith.mulf %9, %13 : vector<1x256xf32>
    %cst_8 = arith.constant 0.000000e+00 : f32
    %15 = vector.broadcast %cst_8 : f32 to vector<1x256xf32>
    %16 = arith.subf %15, %0 : vector<1x256xf32>
    %cst_9 = arith.constant 0.000000e+00 : f32
    %17 = vector.broadcast %cst_9 : f32 to vector<1x256xf32>
    %18 = arith.addf %16, %17 : vector<1x256xf32>
    %cst_10 = arith.constant 1.000000e+00 : f32
    %19 = vector.broadcast %cst_10 : f32 to vector<1x256xf32>
    %20 = arith.mulf %19, %18 : vector<1x256xf32>
    %21 = math.exp %20 : vector<1x256xf32>
    %22 = vector.broadcast %21 : vector<1x256xf32> to vector<50x256xf32>
    %23 = vector.broadcast %1 : vector<50x1xf32> to vector<50x256xf32>
    %24 = arith.subf %22, %23 : vector<50x256xf32>
    %cst_11 = arith.constant 0.000000e+00 : f32
    %25 = vector.broadcast %cst_11 : f32 to vector<50x1xf32>
    %26 = arith.subf %25, %2 : vector<50x1xf32>
    %27 = vector.broadcast %26 : vector<50x1xf32> to vector<50x256xf32>
    %28 = arith.mulf %27, %24 : vector<50x256xf32>
    %29 = arith.mulf %28, %24 : vector<50x256xf32>
    %30 = math.exp %29 : vector<50x256xf32>
    %31 = vector.broadcast %14 : vector<1x256xf32> to vector<50x256xf32>
    %32 = arith.mulf %31, %30 : vector<50x256xf32>
    %c0_12 = arith.constant 0 : index
    %c0_13 = arith.constant 0 : index
    %33 = vector.load %arg4[%c0_12, %c0_13] : memref<50x256xf32, #tpu.memory_space<vmem>>, vector<50x256xf32>
    tpu.vector_store %arg4[%c0_12, %c0_13], %32 {strides = array<i32>} : memref<50x256xf32, #tpu.memory_space<vmem>>, vector<50x256xf32>,
    return
  }
  func.func @transform_0(%arg0: i32) -> (i32, i32) {
    %c0_i32 = arith.constant 0 : i32
    %c0_i32_0 = arith.constant 0 : i32
    return %c0_i32, %arg0 : i32, i32
  }
  func.func @transform_1(%arg0: i32) -> (i32, i32) {
    %c0_i32 = arith.constant 0 : i32
    %c0_i32_0 = arith.constant 0 : i32
    %c0_i32_1 = arith.constant 0 : i32
    return %c0_i32, %c0_i32_0 : i32, i32
  }
  func.func @transform_2(%arg0: i32) -> (i32, i32) {
    %c0_i32 = arith.constant 0 : i32
    %c0_i32_0 = arith.constant 0 : i32
    %c0_i32_1 = arith.constant 0 : i32
    return %c0_i32, %c0_i32_0 : i32, i32
  }
  func.func @transform_3(%arg0: i32) -> (i32, i32) {
    %c0_i32 = arith.constant 0 : i32
    %c0_i32_0 = arith.constant 0 : i32
    return %c0_i32, %arg0 : i32, i32
  }
}

</mosaic_0001>

<bundles_post_ra>
// kernel: tpu_custom_call.1
= control target key start
LH: loop header
LB: loop body
LE: loop exit
PB: predicated region body
PF: predicated region fallthrough
CT: control target
= control target key end

     0   :  { %8 = vsyncpa [#allocation3], 0  ;;  %s979_s0 = inlined_call_operand.vmem [shape: f32[1,512], index: 0, kind: input, shape index: {}]   ;;  %s980_s1 = inlined_call_operand.vmem [shape: f32[50,1], index: 1, kind: input, shape index: {}]   ;;  %s981_s2 = inlined_call_operand.vmem [shape: f32[50,1], index: 2, kind: input, shape index: {}]   ;;  %s982_s3 = inlined_call_operand.hbm [shape: f32[50,512], index: 3, kind: output, shape index: {}]  }
   0x1   :  { %10 = vsyncpa [#allocation3 + $0x1], 0  ;;  %s770_s12 = smov 0   ;;  %s772_s13 = smov 0  }
   0x2   :  { %s774_s14 = smov 0   ;;  %s776_s15 = smov 0  }
   0x3 LB: > { %s791_s16 = sadd.s32 4294967295, %s736_s15   ;;  %s568_s17 = sadd.s32 4294967294, %s736_s15   ;;  %s736_s15 = sphi %s776_s15, %s988_s15   ;;  %s732_s14 = sphi %s774_s14, %s987_s14   ;;  %s728_s13 = sphi %s772_s13, %s986_s13   ;;  %s724_s12 = sphi %s770_s12, %s985_s12  }
   0x4   : > { %s795_s18 = sadd.s32 1, %s736_s15   ;;  %s91_s19 = sadd.s32 1, %s732_s14 }
   0x5   : > { %s88_s20 = ssub.s32 %s736_s15, %s795_s18  ;;  %p101_p0 = scmp.ne.s32.totalorder %s732_s14, %s728_s13 }
   0x6   : > { %p89_p1 = scmp.eq.s32.totalorder %s88_s20, 0  ;;  %p102_p2 = scmp.eq.s32.totalorder %s791_s16, 1 }
   0x7   : > { %p107_p3 = scmp.ne.s32.totalorder %s728_s13, %s724_s12  ;;  %p108_p4 = scmp.eq.s32.totalorder %s568_s17, 1 }
   0x8   : > { %s806_s21 = scalar_select %p89_p1, %s732_s14, %s91_s19  }
   0x9   : > { %p808_p5 = por %p102_p2, %p101_p0  ;;  %p812_p6 = por %p108_p4, %p107_p3 }
   0xa   : > { %p571_p7 = scmp.ge.s32.totalorder %s736_s15, 1  ;;  %p140_p8 = scmp.lt.s32.totalorder %s736_s15, 3 }
   0xc   : > { %p141_p9 = pnand %p571_p7, %p140_p8 }
   0xd   : > { %v172_v0 = vld [vmem:[%s980_s1 + $0x10] sm:$0xff] (!%p141_p9)  ;;  %v170_v1 = vld [vmem:[%s980_s1] sm:$0xff] (!%p141_p9)  ;;  %v738_v2 = vmov (!%p141_p9), 0   ;;  %v173_v3 = vld [vmem:[%s980_s1 + $0x18] sm:$0xff] (!%p141_p9)  ;;  %s572_s5 = sshll.u32 (!%p141_p9), %s791_s16, 1  ;;  %s160_s11 = sand.u32 (!%p141_p9), 1, %s728_s13  }
   0xe   : > { %144 = sbr.rel (%p141_p9) target bundleno = 205 (0xcd), region = 32  ;;  %639 = vset.pattern.permute.xlu1 (!%p141_p9), %v738_v2  ;;  %638 = vset.pattern.permute.xlu0 (!%p141_p9), %v738_v2  ;;  %v171_v4 = vld [vmem:[%s980_s1 + $0x8] sm:$0xff] (!%p141_p9)  ;;  %v174_v6 = vld [vmem:[%s980_s1 + $0x20] sm:$0xff] (!%p141_p9)  ;;  %p164_p10 = scmp.lt.s32.totalorder (!%p141_p9), %s572_s5, 3  ;;  %v176_v9 = vld [vmem:[%s980_s1 + $0x30] sm:$0x3] (!%p141_p9) }
   0xf   : > { %321 = vperm.xlu1 (!%p141_p9), %639, %v172_v0   ;;  %311 = vperm.xlu0 (!%p141_p9), %638, %v170_v1   ;;  %v175_v5 = vld [vmem:[%s980_s1 + $0x28] sm:$0xff] (!%p141_p9)  ;;  %v177_v7 = vld [vmem:[%s981_s2] sm:$0xff] (!%p141_p9)  ;;  %v179_v10 = vld [vmem:[%s981_s2 + $0x10] sm:$0xff] (!%p141_p9)  ;;  %v739_v35 = vmov (!%p141_p9), 683565275   ;;  %s583_s17 = smul.u32 (!%p141_p9), 112, %s160_s11 }
  0x10   : > { %v358_v8 = vsub.f32 (!%p141_p9), 0.0, %v177_v7  ;;  %v178_v11 = vld [vmem:[%s981_s2 + $0x8] sm:$0xff] (!%p141_p9)  ;;  %v360_v14 = vsub.f32 (!%p141_p9), 0.0, %v179_v10  ;;  %v181_v16 = vld [vmem:[%s981_s2 + $0x20] sm:$0xff] (!%p141_p9)  ;;  %v180_v17 = vld [vmem:[%s981_s2 + $0x18] sm:$0xff] (!%p141_p9)  ;;  %s582_s20 = sshll.u32 (!%p141_p9), %s791_s16, 8 }
  0x11   : > { %v359_v15 = vsub.f32 (!%p141_p9), 0.0, %v178_v11  ;;  %v362_v20 = vsub.f32 (!%p141_p9), 0.0, %v181_v16  ;;  %v361_v21 = vsub.f32 (!%p141_p9), 0.0, %v180_v17  ;;  %v183_v23 = vld [vmem:[%s981_s2 + $0x30] sm:$0x3] (!%p141_p9)  ;;  %v182_v24 = vld [vmem:[%s981_s2 + $0x28] sm:$0xff] (!%p141_p9)  ;;  %s926_s26 = scalar_lea.hbm (!%p141_p9), %s982_s3, %s582_s20 }
  0x12   : > { %v364_v27 = vsub.f32 (!%p141_p9), 0.0, %v183_v23  ;;  %v363_v28 = vsub.f32 (!%p141_p9), 0.0, %v182_v24  ;;  %v740_v37 = vmov (!%p141_p9), 2475754826   ;;  %v741_v39 = vmov (!%p141_p9), 2131351028  }
  0x13   : > { %326 = vperm.xlu1 (!%p141_p9), %639, %v173_v3   ;;  %316 = vperm.xlu0 (!%p141_p9), %638, %v171_v4   ;;  %v742_v41 = vmov (!%p141_p9), 2102212464   ;;  %v743_v43 = vmov (!%p141_p9), 920167782   ;;  %v744_v50 = vmov (!%p141_p9), 1326507024  }
  0x14   : > { %s899_s19 = scalar_lea.vmem (!%p141_p9), [#allocation2], %s583_s17  ;;  %s938_s27 = scalar_lea.sflag (!%p141_p9), [#allocation3], %s160_s11 }
  0x15   : > { %s990_s5 = smov (!%p164_p10, %s572_s5), 3  ;;  %s509_s24 = sshll.u32 %s899_s19, 4  ;;  %s930_s24 = int_to_ptr.vmem [resolvable:$true] %s509_s24 }
  0x16   : > { %s166_s29 = scalar_lea.vmem %s979_s0, %s990_s5  ;;  %s674_s28 = scalar_lea.vmem %s930_s24, 1792 }
  0x17   : > { %336 = vperm.xlu1 %639, %v175_v5   ;;  %331 = vperm.xlu0 %638, %v174_v6   ;;  %v852_v12 = vld [vmem:[%s166_s29] sm:$0x3]  ;;  %p675_p11 = scmp.ne.s32.totalorder %s930_s24, %s674_s28  ;;  %s746_s29 = smov [#allocation2]  }
  0x18   : > { %v855_v13 = vmul.f32 0.62831855, %v852_v12  ;;  %vm290_vm13 = vcmp.lt.f32.partialorder %v852_v12, 5.0  ;;  %s678_s30 = sshll.u32 %s746_s29, 4  ;;  %s679_s30 = int_to_ptr.vmem [resolvable:$false] %s678_s30 }
  0x19   : > { %p676_p12 = pnand %p675_p11, %p808_p5  ;;  %s680_s4 = scalar_lea.vmem %s679_s30, 3584 }
  0x1a   : > { %v188_v18 = vand.u32 2139095040, %v855_v13  ;;  %v185_v22 = vand.u32 2147483647, %v855_v13  ;;  %vm187_vm7 = vcmp.lt.s32.totalorder %v855_v13, 0  ;;  %vm277_vm12 = vweird.f32 %v855_v13  ;;  %p681_p0 = scmp.lt.s32.totalorder %s930_s24, %s679_s30  ;;  %p682_p1 = scmp.lt.s32.totalorder %s680_s4, %s674_s28 }
  0x1b   : > { %367 = vperm.xlu1 %639, %v358_v8   ;;  %341 = vperm.xlu0 %638, %v176_v9   ;;  %p677_p13 = pneg %p676_p12 }
  0x1c   : > { %v189_v19 = vshrl.u32 %v188_v18, 23  ;;  %v192_v29 = vand.u32 8388607, %v185_v22  ;;  %vm186_vm8 = vcmp.le.f32.partialorder %v185_v22, 0.7853982  ;;  %p683_p2 = por %p682_p1, %p681_p0 }
  0x1e   : > { %v573_v25 = vadd.s32 4294967169, %v189_v19  ;;  %v193_v32 = vor.u32 8388608, %v192_v29  ;;  %p684_p3 = pnand %p683_p2, %p677_p13 }
  0x1f   : > { %377 = vperm.xlu1 %639, %v360_v14   ;;  %372 = vperm.xlu0 %638, %v359_v15  }
  0x20   : > { %v195_v26 = vadd.s32 1, %v573_v25  ;;  %v233_v52 = vshll.u32 %v193_v32, 8 }
  0x22   : > { %vm196_vm0 = vcmp.gt.s32.totalorder %v195_v26, 0 }
  0x23   : > { %387 = vperm.xlu1 %639, %v362_v20   ;;  %382 = vperm.xlu0 %638, %v361_v21   ;;  %v197_v30 = vsel %vm196_vm0, %v195_v26, 0 }
  0x24   : > { %v199_v31 = vand.u32 31, %v197_v30  ;;  %v198_v33 = vshrl.u32 %v197_v30, 5 }
  0x26   : > { %v200_v34 = vsub.s32 32, %v199_v31  ;;  %v202_v36 = vshll.u32 %v739_v35, %v199_v31  ;;  %v205_v38 = vshll.u32 %v740_v37, %v199_v31  ;;  %v208_v40 = vshll.u32 %v741_v39, %v199_v31 }
  0x27   : > { %397 = vperm.xlu1 %639, %v364_v27   ;;  %392 = vperm.xlu0 %638, %v363_v28   ;;  %v211_v42 = vshll.u32 %v742_v41, %v199_v31  ;;  %v214_v44 = vshll.u32 %v743_v43, %v199_v31  ;;  %vm217_vm1 = vcmp.lt.s32.totalorder %v198_v33, 1  ;;  %vm220_vm2 = vcmp.lt.s32.totalorder %v198_v33, 4 }
  0x28   : > { %v201_v45 = vshrl.u32 %v739_v35, %v200_v34  ;;  %v203_v46 = vshrl.u32 %v740_v37, %v200_v34  ;;  %v206_v47 = vshrl.u32 %v741_v39, %v200_v34  ;;  %v209_v48 = vshrl.u32 %v742_v41, %v200_v34 }
  0x29   : > { %v212_v49 = vshrl.u32 %v743_v43, %v200_v34  ;;  %v215_v51 = vshrl.u32 %v744_v50, %v200_v34  ;;  %vm218_vm3 = vcmp.lt.s32.totalorder %v198_v33, 2  ;;  %vm219_vm4 = vcmp.lt.s32.totalorder %v198_v33, 3 }
  0x2a   : > { %v204_v53 = vor.u32 %v203_v46, %v202_v36  ;;  %v207_v54 = vor.u32 %v206_v47, %v205_v38  ;;  %v210_v55 = vor.u32 %v209_v48, %v208_v40 }
  0x2b   : > { %v213_v56 = vor.u32 %v212_v49, %v211_v42  ;;  %v216_v57 = vor.u32 %v215_v51, %v214_v44 }
  0x2c   : > { %v221_v58 = vsel %vm217_vm1, %v201_v45, %v204_v53  ;;  %v222_v59 = vsel %vm220_vm2, %v210_v55, 2102212464  ;;  %v225_v60 = vsel %vm217_vm1, %v204_v53, %v207_v54  ;;  %v229_v61 = vsel %vm217_vm1, %v207_v54, %v210_v55 }
  0x2d   : > { %v223_v62 = vsel %vm219_vm4, %v207_v54, %v222_v59  ;;  %v226_v63 = vsel %vm220_vm2, %v213_v56, 920167782  ;;  %v230_v0 = vsel %vm220_vm2, %v216_v57, 1326507024  ;;  %v745_v53 = vmov 0.0  }
  0x2e   : > { %v227_v1 = vsel %vm219_vm4, %v210_v55, %v226_v63  ;;  %v231_v2 = vsel %vm219_vm4, %v213_v56, %v230_v0  ;;  %v224_v3 = vsel %vm218_vm3, %v221_v58, %v223_v62  ;;  %v577_v54 = vsel %vm290_vm13, 1.0, %v745_v53 }
  0x2f   : > { %v228_v4 = vsel %vm218_vm3, %v225_v60, %v227_v1  ;;  %v232_v5 = vsel %vm218_vm3, %v229_v61, %v231_v2  ;;  %v240_v10 = vmul.u32 %v233_v52, %v224_v3  ;;  %v294_v57 = vsub.f32 0.0, %v852_v12 }
  0x30   : > { %v873_v6 = vmul.u32.u64.low %v233_v52, %v232_v5  ;;  %v874_v7 = vmul.u32.u64.high %v233_v52, %v232_v5, %v873_v6  ;;  %v876_v8 = vmul.u32.u64.low %v233_v52, %v228_v4  ;;  %v877_v9 = vmul.u32.u64.high %v233_v52, %v228_v4, %v876_v8 }
  0x31   : > { %v296_v58 = vmul.f32 1.442695, %v294_v57  ;;  %v299_v59 = vlaneseq }
  0x32   : > { %vm242_vm5 = vc.u32 %v874_v7, %v876_v8  ;;  %v243_v11 = vadd.s32 1, %v877_v9  ;;  %v241_v25 = vadd.s32 %v876_v8, %v874_v7 }
  0x33   : > { %v300_v60 = vshrl.u32 %v299_v59, 7 }
  0x34   : > { %v244_v14 = vsel %vm242_vm5, %v243_v11, %v877_v9 }
  0x35   : > { %v245_v15 = vadd.s32 %v244_v14, %v240_v10  ;;  %v305_v63 = vsub.s32 1, %v300_v60 }
  0x37   : > { %v246_v16 = vadd.s32 536870912, %v245_v15 }
  0x39   : > { %v247_v17 = vshrl.u32 %v246_v16, 30 }
  0x3b   : > { %v248_v18 = vshll.u32 %v247_v17, 30  ;;  %v271_v39 = vsub.s32 4, %v247_v17 }
  0x3d   : > { %v249_v19 = vsub.s32 %v245_v15, %v248_v18  ;;  %v272_v42 = vsel %vm187_vm7, %v271_v39, %v247_v17 }
  0x3e   : > { %v274_v43 = vsel %vm186_vm8, 0, %v272_v42 }
  0x3f   : > { %v251_v20 = vsub.s32 0, %v249_v19  ;;  %v278_v44 = vand.u32 3, %v274_v43 }
  0x41   : > { %v574_v21 = vmin.u32 %v251_v20, %v249_v19  ;;  %vm283_vm9 = vcmp.eq.s32.totalorder %v278_v44, 2  ;;  %vm280_vm10 = vcmp.eq.s32.totalorder %v278_v44, 0  ;;  %vm279_vm11 = vcmp.lt.s32.totalorder %v278_v44, 2 }
  0x43   : > { %v253_v23 = vclz %v574_v21 }
  0x45   : > { %v575_v24 = vadd.s32 4294967294, %v253_v23 }
  0x47   : > { %vm576_vm6 = vcmp.lt.s32.totalorder %v575_v24, 0 }
  0x48   : > { %v256_v26 = vsel %vm576_vm6, 0, %v575_v24 }
  0x49   : > { %v257_v27 = vsub.s32 32, %v256_v26  ;;  %v258_v28 = vshll.u32 %v249_v19, %v256_v26  ;;  %v261_v29 = vsub.s32 4294967266, %v256_v26 }
  0x4b   : > { %v259_v30 = vshrl.u32 %v241_v25, %v257_v27  ;;  %v262_v31 = vadd.s32 127, %v261_v29 }
  0x4d   : > { %v260_v32 = vor.u32 %v259_v30, %v258_v28  ;;  %v263_v33 = vshll.u32 %v262_v31, 23 }
  0x4f   : > { %v264_v34 = vor.u32 4788187, %v263_v33  ;;  %v267_v35 = vcvt.s32.f32 %v260_v32 }
  0x51   : > { %v265_v36 = vand.u32 2147483647, %v264_v34 }
  0x53   : > { %v268_v37 = vmul.f32 %v267_v35, %v265_v36 }
  0x55   : > { %v269_v38 = vxor.u32 2147483648, %v268_v37 }
  0x57   : > { %v270_v40 = vsel %vm187_vm7, %v269_v38, %v268_v37 }
  0x58   : > { %v273_v41 = vsel %vm186_vm8, %v855_v13, %v270_v40  ;;  %v301_v13 = vsub.s32 0, %v300_v60 }
  0x59   : > { %640 = vcosq.f32 %v273_v41 }
  0x5a   : > { %642 = vsinq.f32 %v273_v41 }
  0x5b   : > { %644 = vpow2.f32 %v296_v58 }
  0x63   : > { %v641_v45 = vpop.eup %640 }
  0x64   : > { %v643_v46 = vpop.eup %642  ;;  %v284_v47 = vxor.u32 2147483648, %v641_v45 }
  0x65   : > { %v281_v48 = vxor.u32 2147483648, %v643_v46  ;;  %v645_v0 = vpop.eup %644 }
  0x66   : > { %v285_v22 = vsel %vm283_vm9, %v284_v47, %v643_v46  ;;  %v302_v3 = vrot.slane %v645_v0, %v301_v13  ;;  %v306_v4 = vrot.slane %v645_v0, %v305_v63 }
  0x67   : > { %v282_v49 = vsel %vm280_vm10, %v641_v45, %v281_v48 }
  0x68   : > { %v286_v50 = vsel %vm279_vm11, %v282_v49, %v285_v22 }
  0x69   : > { %v287_v51 = vsel %vm277_vm12, nan, %v286_v50 }
  0x6a   : > { %v288_v52 = vadd.f32 1.0, %v287_v51 }
  0x6c   : > { %v289_v55 = vmul.f32 0.5, %v288_v52 }
  0x6e   : > { %v293_v56 = vmul.f32 %v577_v54, %v289_v55 }
  0x70   : > { %v890_v14 = vrot.slane %v293_v56, %v301_v13  ;;  %v892_v15 = vrot.slane %v293_v56, %v305_v63 }
  0x8e   : > { %v322_v61 = vpop.permute.xlu1 %321  ;;  %v312_v62 = vpop.permute.xlu0 %311 }
  0x8f   : > { %v344_v7 = vsub.f32 %v302_v3, %v312_v62  ;;  %v345_v8 = vsub.f32 %v306_v4, %v312_v62  ;;  %v348_v16 = vsub.f32 %v302_v3, %v322_v61  ;;  %v349_v17 = vsub.f32 %v306_v4, %v322_v61 }
  0x92   : > { %v327_v1 = vpop.permute.xlu1 %326  ;;  %v317_v2 = vpop.permute.xlu0 %316 }
  0x93   : > { %v350_v20 = vsub.f32 %v302_v3, %v327_v1  ;;  %v351_v21 = vsub.f32 %v306_v4, %v327_v1  ;;  %v346_v23 = vsub.f32 %v302_v3, %v317_v2  ;;  %v347_v24 = vsub.f32 %v306_v4, %v317_v2 }
  0x96   : > { %v337_v5 = vpop.permute.xlu1 %336  ;;  %v332_v6 = vpop.permute.xlu0 %331 }
  0x97   : > { %v354_v31 = vsub.f32 %v302_v3, %v337_v5  ;;  %v352_v32 = vsub.f32 %v302_v3, %v332_v6  ;;  %v353_v35 = vsub.f32 %v306_v4, %v332_v6  ;;  %v355_v38 = vsub.f32 %v306_v4, %v337_v5 }
  0x9a   : > { %v368_v9 = vpop.permute.xlu1 %367  ;;  %v342_v10 = vpop.permute.xlu0 %341 }
  0x9b   : > { %v400_v12 = vmul.f32 %v368_v9, %v344_v7  ;;  %v401_v11 = vmul.f32 %v368_v9, %v345_v8  ;;  %v356_v50 = vsub.f32 %v302_v3, %v342_v10  ;;  %v357_v53 = vsub.f32 %v306_v4, %v342_v10 }
  0x9d   : > { %v414_v18 = vmul.f32 %v400_v12, %v344_v7  ;;  %v415_v19 = vmul.f32 %v401_v11, %v345_v8 }
  0x9e   : > { %v378_v25 = vpop.permute.xlu1 %377  ;;  %v373_v26 = vpop.permute.xlu0 %372 }
  0x9f   : > { %v428_v27 = vmul.f32 1.442695, %v414_v18  ;;  %v430_v28 = vmul.f32 1.442695, %v415_v19  ;;  %v404_v29 = vmul.f32 %v378_v25, %v348_v16  ;;  %v405_v30 = vmul.f32 %v378_v25, %v349_v17 }
  0xa0   : > { %v402_v33 = vmul.f32 %v373_v26, %v346_v23  ;;  %v403_v34 = vmul.f32 %v373_v26, %v347_v24 }
  0xa1   : > { %646 = vpow2.f32 %v428_v27  ;;  %v418_v36 = vmul.f32 %v404_v29, %v348_v16  ;;  %v419_v37 = vmul.f32 %v405_v30, %v349_v17 }
  0xa2   : > { %648 = vpow2.f32 %v430_v28  ;;  %v416_v39 = vmul.f32 %v402_v33, %v346_v23  ;;  %v417_v40 = vmul.f32 %v403_v34, %v347_v24  ;;  %v388_v41 = vpop.permute.xlu1 %387  ;;  %v383_v42 = vpop.permute.xlu0 %382 }
  0xa3   : > { %v436_v43 = vmul.f32 1.442695, %v418_v36  ;;  %v438_v44 = vmul.f32 1.442695, %v419_v37  ;;  %v408_v45 = vmul.f32 %v388_v41, %v352_v32  ;;  %v409_v46 = vmul.f32 %v388_v41, %v353_v35 }
  0xa4   : > { %v432_v47 = vmul.f32 1.442695, %v416_v39  ;;  %v434_v48 = vmul.f32 1.442695, %v417_v40  ;;  %v406_v22 = vmul.f32 %v383_v42, %v350_v20  ;;  %v407_v49 = vmul.f32 %v383_v42, %v351_v21 }
  0xa5   : > { %650 = vpow2.f32 %v436_v43  ;;  %v422_v51 = vmul.f32 %v408_v45, %v352_v32  ;;  %v423_v52 = vmul.f32 %v409_v46, %v353_v35 }
  0xa6   : > { %652 = vpow2.f32 %v438_v44  ;;  %v420_v54 = vmul.f32 %v406_v22, %v350_v20  ;;  %v421_v55 = vmul.f32 %v407_v49, %v351_v21  ;;  %v398_v56 = vpop.permute.xlu1 %397  ;;  %v393_v57 = vpop.permute.xlu0 %392 }
  0xa7   : > { %654 = vpow2.f32 %v432_v47  ;;  %v444_v58 = vmul.f32 1.442695, %v422_v51  ;;  %v446_v59 = vmul.f32 1.442695, %v423_v52  ;;  %v412_v60 = vmul.f32 %v398_v56, %v356_v50 }
  0xa8   : > { %656 = vpow2.f32 %v434_v48  ;;  %v440_v61 = vmul.f32 1.442695, %v420_v54  ;;  %v442_v62 = vmul.f32 1.442695, %v421_v55  ;;  %v413_v13 = vmul.f32 %v398_v56, %v357_v53 }
  0xa9   : > { %658 = vpow2.f32 %v444_v58  ;;  %v426_v63 = vmul.f32 %v412_v60, %v356_v50  ;;  %v410_v0 = vmul.f32 %v393_v57, %v354_v31  ;;  %v411_v1 = vmul.f32 %v393_v57, %v355_v38 }
  0xaa   : > { %660 = vpow2.f32 %v446_v59  ;;  %v427_v2 = vmul.f32 %v413_v13, %v357_v53 }
  0xab   : > { %v647_v3 = vpop.eup %646  ;;  %662 = vpow2.f32 %v440_v61  ;;  %v452_v4 = vmul.f32 1.442695, %v426_v63  ;;  %v424_v5 = vmul.f32 %v410_v0, %v354_v31  ;;  %v425_v6 = vmul.f32 %v411_v1, %v355_v38 }
  0xac   : > { %v649_v7 = vpop.eup %648  ;;  %v467_v8 = vmul.f32 %v647_v3, %v890_v14  ;;  %664 = vpow2.f32 %v442_v62  ;;  %v454_v9 = vmul.f32 1.442695, %v427_v2 }
  0xad   : > { %v468_v10 = vmul.f32 %v649_v7, %v892_v15  ;;  %666 = vpow2.f32 %v452_v4  ;;  %v448_v12 = vmul.f32 1.442695, %v424_v5  ;;  %v450_v11 = vmul.f32 1.442695, %v425_v6 }
  0xae   : > { %481 = vst [vmem:[%s899_s19] sm:$0xff] %v467_v8  ;;  %668 = vpow2.f32 %v454_v9 }
  0xaf   : > { %v651_v16 = vpop.eup %650  ;;  %482 = vst [vmem:[%s899_s19 + $0x8] sm:$0xff] %v468_v10  ;;  %670 = vpow2.f32 %v448_v12 }
  0xb0   : > { %v653_v17 = vpop.eup %652  ;;  %v471_v18 = vmul.f32 %v651_v16, %v890_v14  ;;  %672 = vpow2.f32 %v450_v11 }
  0xb1   : > { %v655_v19 = vpop.eup %654  ;;  %v472_v20 = vmul.f32 %v653_v17, %v892_v15 }
  0xb2   : > { %v657_v21 = vpop.eup %656  ;;  %485 = vst [vmem:[%s899_s19 + $0x20] sm:$0xff] %v471_v18  ;;  %v469_v23 = vmul.f32 %v655_v19, %v890_v14 }
  0xb3   : > { %v659_v24 = vpop.eup %658  ;;  %486 = vst [vmem:[%s899_s19 + $0x28] sm:$0xff] %v472_v20  ;;  %v470_v25 = vmul.f32 %v657_v21, %v892_v15 }
  0xb4   : > { %v661_v26 = vpop.eup %660  ;;  %483 = vst [vmem:[%s899_s19 + $0x10] sm:$0xff] %v469_v23  ;;  %v475_v27 = vmul.f32 %v659_v24, %v890_v14 }
  0xb5   : > { %v663_v28 = vpop.eup %662  ;;  %484 = vst [vmem:[%s899_s19 + $0x18] sm:$0xff] %v470_v25  ;;  %v476_v29 = vmul.f32 %v661_v26, %v892_v15 }
  0xb6   : > { %v665_v30 = vpop.eup %664  ;;  %489 = vst [vmem:[%s899_s19 + $0x40] sm:$0xff] %v475_v27  ;;  %v473_v31 = vmul.f32 %v663_v28, %v890_v14 }
  0xb7   : > { %v667_v32 = vpop.eup %666  ;;  %490 = vst [vmem:[%s899_s19 + $0x48] sm:$0xff] %v476_v29  ;;  %v474_v33 = vmul.f32 %v665_v30, %v892_v15 }
  0xb8   : > { %v669_v34 = vpop.eup %668  ;;  %487 = vst [vmem:[%s899_s19 + $0x30] sm:$0xff] %v473_v31  ;;  %v479_v35 = vmul.f32 %v667_v32, %v890_v14 }
  0xb9   : > { %v671_v36 = vpop.eup %670  ;;  %488 = vst [vmem:[%s899_s19 + $0x38] sm:$0xff] %v474_v33  ;;  %v480_v37 = vmul.f32 %v669_v34, %v892_v15 }
  0xba   : > { %v673_v38 = vpop.eup %672  ;;  %493 = vst [vmem:[%s899_s19 + $0x60] sm:$0x3] %v479_v35  ;;  %v477_v39 = vmul.f32 %v671_v36, %v890_v14 }
  0xbb   : > { %494 = vst [vmem:[%s899_s19 + $0x68] sm:$0x3] %v480_v37  ;;  %v478_v40 = vmul.f32 %v673_v38, %v892_v15 }
  0xbc   : > { %491 = vst [vmem:[%s899_s19 + $0x50] sm:$0xff] %v477_v39 }
  0xbd   : > { %492 = vst [vmem:[%s899_s19 + $0x58] sm:$0xff] %v478_v40 }
  0xbe   : > { %687 = shalt.err (!%p684_p3)
}
  0xbf   : > { %s688_s6 = scalar_lea.hbm %s926_s26, 1792  ;;  %s692_s8 = scalar_lea.hbm %s982_s3, 3584 }
  0xc0   : > { %p689_p4 = scmp.ne.s32.totalorder %s926_s26, %s688_s6  ;;  %p693_p9 = scmp.lt.u32.totalorder %s926_s26, %s982_s3 }
  0xc1   : > { %p694_p10 = scmp.lt.u32.totalorder %s692_s8, %s688_s6  ;;  %p696_p12 = scmp.lt.u32.totalorder %s688_s6, %s926_s26 }
  0xc2   : > { %p690_p7 = pnand %p689_p4, %p808_p5 }
  0xc3   : > { %p695_p11 = por %p694_p10, %p693_p9 }
  0xc4   : > { %p691_p8 = pneg %p690_p7 }
  0xc5   : > { %p697_p13 = por %p696_p12, %p695_p11 }
  0xc7   : > { %p698_p0 = pnand %p697_p13, %p691_p8 }
  0xc9   : > { %701 = shalt.err (!%p698_p0)
}
  0xca   : > { %s747_s11 = smov 256   ;;  %s748_s17 = smov 512  }
  0xcb   : > { %s749_s19 = smov 16  }
  0xcc   : > { %588 = dma.vmem_to_hbm [thread:$0]  (%p808_p5), %s930_s24, 1792, %s926_s26, %s938_s27, %s747_s11, %s748_s17, %s749_s19  }
  0xcd PF: > { %p594_p1 = scmp.ge.s32.totalorder %s736_s15, 2  ;;  %s524_s20 = sand.u32 1, %s724_s12  }
  0xce   : > { %s525_s25 = scalar_lea.sflag [#allocation3], %s524_s20 }
  0xcf   : > { %p591_p2 = pnand %p594_p1, %p812_p6 }
  0xd1   : > { %719 = dma.done.wait (!%p591_p2), %s525_s25, 1792  }
  0xd2   : > { %721 = vsyncadd (!%p591_p2), %s525_s25, 4294965504  ;;  %p13_p3 = scmp.ge.s32.totalorder %s795_s18, 4   ;;  %s985_s12 = smov %s728_s13 }
  0xd3   : > { %s986_s13 = smov %s732_s14  ;;  %s987_s14 = smov %s806_s21 }
  0xd4   : > { %s988_s15 = smov %s795_s18  ;;  %15 = sbr.rel (!%p13_p3) target bundleno = 3 (0x3), region = 67 }
  0xdb   :  { %530 = vsyncpa [#allocation3], 1 }
  0xdc   :  { %532 = vsyncpa [#allocation3 + $0x1], 1 }

</bundles_post_ra>
